<compile_context>
chip_gen: v5e
topology: v5e:2x2
jax: 0.10.0
libtpu: 0.0.40
codegen_flags: <defaults>
</compile_context>

<pallas_src>
import functools

import jax
import jax.numpy as jnp
from jax.experimental import pallas as pl
from jax.experimental.pallas import tpu as pltpu


_N_SINGLE_BLOCK_MAX = 512   # take the whole N in one block up to this size
_M_TILE_CAP = 512
_K_STEP_CAP = 2048


def _round_up(x, m):
    return ((x + m - 1) // m) * m


def _largest_aligned_divisor(total, align, cap):
    """Largest multiple of `align` that divides `total` and is <= cap."""
    best = align
    t = align
    limit = min(total, cap)
    while t <= limit:
        if total % t == 0:
            best = t
        t += align
    return best


@functools.lru_cache(maxsize=None)
def _vmem_limits():
    """(vmem_limit_bytes for the compiler, tile budget) per TPU generation."""
    try:
        phys = int(pltpu.get_tpu_info().vmem_capacity_bytes)
    except Exception:
        phys = None
    if not phys or phys <= 0:
        phys = 64 * 1024 * 1024          # conservative: v7x per-core VMEM
    limit = min((phys * 3) // 4, 100 * 1024 * 1024)   # v5e/v6e: 96 MiB, v7x: 48 MiB
    budget = (limit * 3) // 4                          # headroom for compiler scratch
    return limit, budget


def _pick_tk(dp, tm, tn, vmem_budget, max_tk=None):
    """Largest K tile (multiple of 128, divisor of dp) fitting the VMEM budget."""

    def footprint(tk):
        # double-buffered x (f32) + W (bf16) blocks, resident f32 output block
        # (+ writeback copy), bias block.
        return 2 * (tm * tk * 4 + tn * tk * 2) + 2 * (tm * tn * 4) + 2 * (tn * 4)

    hard_cap = dp if max_tk is None else min(dp, max_tk)
    # Prefer the whole reduction in a single step when it fits.
    if hard_cap == dp and footprint(dp) <= vmem_budget:
        return dp
    step_cap = min(hard_cap, _K_STEP_CAP)
    best = 128
    t = 128
    while t <= step_cap:
        if dp % t == 0 and footprint(t) <= vmem_budget:
            best = t
        t += 128
    return best


def _qlinear_kernel(x_ref, w_ref, b_ref, o_ref):
    # x_ref: (tm, tk) f32 activations
    # w_ref: (tn, tk) bf16 weight in natural (A, D) layout
    # b_ref: (1, tn)  f32 bias
    # o_ref: (tm, tn) f32 output — block index is K-invariant => resident
    #        accumulator across the reduction axis.
    k = pl.program_id(2)

    @pl.when(k == 0)
    def _():
        o_ref[...] = jnp.broadcast_to(b_ref[...], o_ref.shape)

    o_ref[...] += jax.lax.dot_general(
        x_ref[...].astype(jnp.bfloat16),
        w_ref[...],
        dimension_numbers=(((1,), (1,)), ((), ())),   # contract last dims (x @ W.T)
        preferred_element_type=jnp.float32,
    )


def prepare_qlinear_params(weight, bias, *, weight_dtype=jnp.bfloat16):
    """One-time (outside the hot path) weight/bias preparation.

    Keeps the weight in its natural (num_actions, input_dim) layout:
      * num_actions pads only to 8 (sublanes) when it fits a single N block,
        otherwise to a multiple of 128 for lane-dense N tiling,
      * input_dim pads to a multiple of 128 (lanes),
      * dtype is bf16 (halves HBM weight traffic vs f32; f32 accumulation is
        preserved via preferred_element_type on the MXU).
    """
    a, d = weight.shape
    dp = _round_up(d, 128)
    ap = _round_up(a, 8) if a <= _N_SINGLE_BLOCK_MAX else _round_up(a, 128)
    w_p = jnp.zeros((ap, dp), weight_dtype).at[:a, :d].set(weight.astype(weight_dtype))
    b_p = jnp.zeros((1, ap), jnp.float32).at[0, :a].set(bias.astype(jnp.float32))
    return w_p, b_p


@functools.partial(jax.jit, static_argnames=("num_actions", "max_tk"))
def qlinear_forward(x, w_prepared, b_prepared, *, num_actions, max_tk=None):
    """out = flatten(x, 1) @ W.T + b with W prepared as (Ap, Dp) bf16."""
    batch = x.shape[0]
    x2d = x.reshape(batch, -1)                      # torch.flatten(x, 1, -1)
    d = x2d.shape[1]
    ap, dp = w_prepared.shape
    assert d <= dp, "activation feature dim exceeds prepared weight"

    mp = _round_up(batch, 8)
    # Hot-path pad only when needed: M to 8 sublanes, D to 128 lanes.  tk is
    # always chosen as a divisor of dp, so no additional K padding is required.
    if (mp, dp) != (batch, d):
        x2d = jnp.pad(x2d, ((0, mp - batch), (0, dp - d)))

    vmem_limit, vmem_budget = _vmem_limits()
    tm = _largest_aligned_divisor(mp, 8, _M_TILE_CAP)
    if ap <= _N_SINGLE_BLOCK_MAX:
        tn = ap                                      # single N block (full dim)
    else:
        tn = _largest_aligned_divisor(ap, 128, _N_SINGLE_BLOCK_MAX)
    tk = _pick_tk(dp, tm, tn, vmem_budget, max_tk)

    # Guard against grid/padding mismatches (would silently drop blocks).
    assert mp % tm == 0 and ap % tn == 0 and dp % tk == 0, (mp, tm, ap, tn, dp, tk)

    grid = (mp // tm, ap // tn, dp // tk)            # reduction axis last

    out = pl.pallas_call(
        _qlinear_kernel,
        out_shape=jax.ShapeDtypeStruct((mp, ap), jnp.float32),
        grid_spec=pltpu.PrefetchScalarGridSpec(
            num_scalar_prefetch=0,
            grid=grid,
            in_specs=[
                pl.BlockSpec((tm, tk), lambda i, j, k: (i, k)),   # activations
                pl.BlockSpec((tn, tk), lambda i, j, k: (j, k)),   # weight (A, D)
                pl.BlockSpec((1, tn), lambda i, j, k: (0, j)),    # bias
            ],
            out_specs=pl.BlockSpec((tm, tn), lambda i, j, k: (i, j)),
        ),
        compiler_params=pltpu.CompilerParams(
            dimension_semantics=("parallel", "parallel", "arbitrary"),
            vmem_limit_bytes=vmem_limit,
        ),
    )(x2d, w_prepared, b_prepared)

    return out[:batch, :num_actions]


if __name__ == "__main__":
    key = jax.random.PRNGKey(0)
    k_x, k_w, k_b = jax.random.split(key, 3)

    # Small shapes: x = (batch=2, 8, 128) -> flattened input_dim = 1024.
    batch, d0, d1 = 2, 8, 128
    input_dim = d0 * d1
    num_actions = 8

    x = jax.random.normal(k_x, (batch, d0, d1), dtype=jnp.float32)

    # Deterministic PyTorch-style init: uniform(-1/sqrt(fan_in), 1/sqrt(fan_in)).
    bound = 1.0 / (input_dim ** 0.5)
    weight = jax.random.uniform(
        k_w, (num_actions, input_dim), jnp.float32, -bound, bound
    )
    bias = jax.random.uniform(k_b, (num_actions,), jnp.float32, -bound, bound)

    # One-time parameter prep (outside the hot path): bf16 weight in (A, D)
    # layout, sublane-padded only (no 16x lane blow-up for small A).
    w_prep, b_prep = prepare_qlinear_params(weight, bias)
    w_prep, b_prep = jax.block_until_ready((w_prep, b_prep))

    ref = x.reshape(batch, -1) @ weight.T + bias     # f32 reference

    # 1) Default path: whole K in one step (grid K extent = 1).
    out = jax.block_until_ready(
        qlinear_forward(x, w_prep, b_prep, num_actions=num_actions)
    )
    assert out.shape == (batch, num_actions)
    err1 = float(jnp.max(jnp.abs(out - ref)))
    assert jnp.allclose(out, ref, atol=3e-2, rtol=3e-2), err1

    # 2) Force multiple K steps (tk=256 -> 4 reduction steps) to exercise the
    #    resident-output accumulation / bias-init path.
    out2 = jax.block_until_ready(
        qlinear_forward(x, w_prep, b_prep, num_actions=num_actions, max_tk=256)
    )
    err2 = float(jnp.max(jnp.abs(out2 - ref)))
    assert jnp.allclose(out2, ref, atol=3e-2, rtol=3e-2), err2

    print("KERNEL_OK")
</pallas_src>

<mosaic_0001>
module attributes {stable_mosaic.version = 11 : i64} {
  func.func @_qlinear_kernel(%arg0: i32, %arg1: i32, %arg2: i32, %arg3: memref<8x1024xf32, #tpu.memory_space<vmem>>, %arg4: memref<8x1024xbf16, #tpu.memory_space<vmem>>, %arg5: memref<1x8xf32, #tpu.memory_space<vmem>>, %arg6: memref<8x8xf32, #tpu.memory_space<vmem>>) attributes {dimension_semantics = [#tpu.dimension_semantics<parallel>, #tpu.dimension_semantics<parallel>, #tpu.dimension_semantics<arbitrary>], iteration_bounds = array<i64: 1, 1, 1>, scalar_prefetch = 0 : i64, scratch_operands = 0 : i64, tpu.core_type = #tpu.core_type<tc>, window_params = [{transform_indices = @transform_0, window_bounds = array<i64: 8, 1024>}, {transform_indices = @transform_1, window_bounds = array<i64: 8, 1024>}, {transform_indices = @transform_2, window_bounds = array<i64: 1, 8>}, {transform_indices = @transform_3, window_bounds = array<i64: 8, 8>}]} {
    %c0_i32 = arith.constant 0 : i32
    %0 = arith.cmpi eq, %arg2, %c0_i32 : i32
    %1 = arith.extui %0 : i1 to i32
    %c0_i32_0 = arith.constant 0 : i32
    %2 = arith.cmpi ne, %1, %c0_i32_0 : i32
    scf.if %2 {
      %c0_8 = arith.constant 0 : index
      %c0_9 = arith.constant 0 : index
      %10 = vector.load %arg5[%c0_8, %c0_9] : memref<1x8xf32, #tpu.memory_space<vmem>>, vector<1x8xf32>
      %11 = vector.shape_cast %10 : vector<1x8xf32> to vector<1x8xf32>
      %12 = vector.broadcast %11 : vector<1x8xf32> to vector<8x8xf32>
      %c0_10 = arith.constant 0 : index
      %c0_11 = arith.constant 0 : index
      %13 = vector.load %arg6[%c0_10, %c0_11] : memref<8x8xf32, #tpu.memory_space<vmem>>, vector<8x8xf32>
      tpu.vector_store %arg6[%c0_10, %c0_11], %12 {strides = array<i32>} : memref<8x8xf32, #tpu.memory_space<vmem>>, vector<8x8xf32>,
    } else {
    }
    %c0 = arith.constant 0 : index
    %c0_1 = arith.constant 0 : index
    %3 = vector.load %arg6[%c0, %c0_1] : memref<8x8xf32, #tpu.memory_space<vmem>>, vector<8x8xf32>
    %c0_2 = arith.constant 0 : index
    %c0_3 = arith.constant 0 : index
    %4 = vector.load %arg3[%c0_2, %c0_3] : memref<8x1024xf32, #tpu.memory_space<vmem>>, vector<8x1024xf32>
    %5 = arith.truncf %4 : vector<8x1024xf32> to vector<8x1024xbf16>
    %c0_4 = arith.constant 0 : index
    %c0_5 = arith.constant 0 : index
    %6 = vector.load %arg4[%c0_4, %c0_5] : memref<8x1024xbf16, #tpu.memory_space<vmem>>, vector<8x1024xbf16>
    %cst = arith.constant dense<0.000000e+00> : vector<8x8xf32>
    %7 = tpu.matmul %5, %6, %cst {dimension_numbers = #tpu.dot_dimension_numbers<[1], [1], [0], [0], [0, 0, 1, 0], [], []>} : vector<8x1024xbf16>, vector<8x1024xbf16>, vector<8x8xf32> -> vector<8x8xf32>
    %8 = arith.addf %3, %7 : vector<8x8xf32>
    %c0_6 = arith.constant 0 : index
    %c0_7 = arith.constant 0 : index
    %9 = vector.load %arg6[%c0_6, %c0_7] : memref<8x8xf32, #tpu.memory_space<vmem>>, vector<8x8xf32>
    tpu.vector_store %arg6[%c0_6, %c0_7], %8 {strides = array<i32>} : memref<8x8xf32, #tpu.memory_space<vmem>>, vector<8x8xf32>,
    return
  }
  func.func @transform_0(%arg0: i32, %arg1: i32, %arg2: i32) -> (i32, i32) {
    %c0_i32 = arith.constant 0 : i32
    return %arg0, %arg2 : i32, i32
  }
  func.func @transform_1(%arg0: i32, %arg1: i32, %arg2: i32) -> (i32, i32) {
    %c0_i32 = arith.constant 0 : i32
    return %arg1, %arg2 : i32, i32
  }
  func.func @transform_2(%arg0: i32, %arg1: i32, %arg2: i32) -> (i32, i32) {
    %c0_i32 = arith.constant 0 : i32
    %c0_i32_0 = arith.constant 0 : i32
    return %c0_i32, %arg1 : i32, i32
  }
  func.func @transform_3(%arg0: i32, %arg1: i32, %arg2: i32) -> (i32, i32) {
    %c0_i32 = arith.constant 0 : i32
    return %arg0, %arg1 : i32, i32
  }
}

</mosaic_0001>

<bundles_post_ra>
// kernel: qlinear_forward.1
= control target key start
LH: loop header
LB: loop body
LE: loop exit
PB: predicated region body
PF: predicated region fallthrough
CT: control target
= control target key end

     0   :  { %vm23_vm0 = vcmask 64512   ;;  %s256_s1 = inlined_call_operand.vmem [shape: bf16[8,1024], index: 1, kind: input, shape index: {}]   ;;  %s257_s0 = inlined_call_operand.vmem [shape: f32[8,1024], index: 0, kind: input, shape index: {}]   ;;  %s258_s2 = inlined_call_operand.vmem [shape: f32[1,8], index: 2, kind: input, shape index: {}]   ;;  %s259_s3 = inlined_call_operand.vmem [shape: f32[8,8], index: 3, kind: output, shape index: {}]  }
   0x1   :  { %v42_v0 = vld [vmem:[%s256_s1] sm:$0xff]  ;;  %v43_v1 = vld [vmem:[%s256_s1 + $0x8] sm:$0xff]  ;;  %v45_v6 = vld [vmem:[%s256_s1 + $0x18] sm:$0xff] }
   0x2   :  { %v50_v2 = vunpack.c.l.b16 %v42_v0  ;;  %v51_v3 = vunpack.c.h.b16 %v42_v0  ;;  %v52_v4 = vunpack.c.l.b16 %v43_v1  ;;  %v53_v5 = vunpack.c.h.b16 %v43_v1  ;;  %v44_v7 = vld [vmem:[%s256_s1 + $0x10] sm:$0xff]  ;;  %v26_v16 = vld [vmem:[%s257_s0] sm:$0xff]  ;;  %v27_v17 = vld [vmem:[%s257_s0 + $0x8] sm:$0xff] }
   0x3   :  { %v56_v12 = vunpack.c.l.b16 %v45_v6  ;;  %v57_v13 = vunpack.c.h.b16 %v45_v6  ;;  %v54_v14 = vunpack.c.l.b16 %v44_v7  ;;  %v55_v15 = vunpack.c.h.b16 %v44_v7  ;;  %v28_v18 = vld [vmem:[%s257_s0 + $0x10] sm:$0xff]  ;;  %v29_v19 = vld [vmem:[%s257_s0 + $0x18] sm:$0xff]  ;;  %v30_v28 = vld [vmem:[%s257_s0 + $0x20] sm:$0xff] }
   0x4   :  { %v58_v8 = vpack.c.b16 %v50_v2, %v50_v2  ;;  %v59_v9 = vpack.c.b16 %v51_v3, %v51_v3  ;;  %v60_v10 = vpack.c.b16 %v52_v4, %v52_v4  ;;  %v61_v11 = vpack.c.b16 %v53_v5, %v53_v5  ;;  %v31_v29 = vld [vmem:[%s257_s0 + $0x28] sm:$0xff]  ;;  %v32_v30 = vld [vmem:[%s257_s0 + $0x30] sm:$0xff]  ;;  %v33_v31 = vld [vmem:[%s257_s0 + $0x38] sm:$0xff] }
   0x5   :  { %v64_v20 = vpack.c.b16 %v56_v12, %v56_v12  ;;  %v65_v21 = vpack.c.b16 %v57_v13, %v57_v13  ;;  %v62_v22 = vpack.c.b16 %v54_v14, %v54_v14  ;;  %v63_v23 = vpack.c.b16 %v55_v15, %v55_v15  ;;  %v185_v36 = vld [vmem:[%s258_s2] ss:$0 sm:$0xff] }
   0x6   :  { %81 = vmatpush.bf16.xpose.msra.mxu0 %v58_v8  ;;  %94 = vmatpush.bf16.xpose.msra.mxu1 %v59_v9  ;;  %v34_v24 = vpack.c.bf16 %v26_v16, %v26_v16  ;;  %v35_v25 = vpack.c.bf16 %v27_v17, %v27_v17  ;;  %v36_v26 = vpack.c.bf16 %v28_v18, %v28_v18 }
   0x7   :  { %107 = vmatpush.bf16.xpose.msra.mxu2 %v60_v10  ;;  %120 = vmatpush.bf16.xpose.msra.mxu3 %v61_v11  ;;  %v37_v27 = vpack.c.bf16 %v29_v19, %v29_v19  ;;  %v38_v32 = vpack.c.bf16 %v30_v28, %v30_v28  ;;  %v39_v33 = vpack.c.bf16 %v31_v29, %v31_v29 }
   0x8   :  { %v40_v34 = vpack.c.bf16 %v32_v30, %v32_v30  ;;  %v41_v35 = vpack.c.bf16 %v33_v31, %v33_v31  ;;  %24 = vst.msk [vmem:[%s259_s3] sm:$0xff] %vm23_vm0, %v185_v36 }
   0xd   :  { %82 = vmatmul.bf16.vlgmr.msra.gmra.mxu0 %v34_v24  ;;  %95 = vmatmul.bf16.vlgmr.msra.gmra.mxu1 %v35_v25 }
   0xe   :  { %133 = vmatpush.bf16.xpose.msrb.mxu0 %v62_v22  ;;  %146 = vmatpush.bf16.xpose.msrb.mxu1 %v63_v23 }
   0xf   :  { %159 = vmatpush.bf16.xpose.msrb.mxu2 %v64_v20  ;;  %172 = vmatpush.bf16.xpose.msrb.mxu3 %v65_v21  ;;  %v25_v57 = vld [vmem:[%s259_s3] sm:$0xff] }
  0x10   :  { %108 = vmatmul.bf16.vlgmr.msra.gmra.mxu2 %v36_v26  ;;  %121 = vmatmul.bf16.vlgmr.msra.gmra.mxu3 %v37_v27 }
  0x1d   :  { %134 = vmatmul.bf16.vlgmr.msrb.gmra.mxu0 %v38_v32  ;;  %147 = vmatmul.bf16.vlgmr.msrb.gmra.mxu1 %v39_v33 }
  0x20   :  { %160 = vmatmul.bf16.vlgmr.msrb.gmra.mxu2 %v40_v34  ;;  %173 = vmatmul.bf16.vlgmr.msrb.gmra.mxu3 %v41_v35 }
  0x8a   :  { %v83_v37 = vpop.f32.mrf.mxu0  ;;  %v96_v38 = vpop.f32.mrf.mxu1 }
  0x8b   :  { %v97_v41 = vadd.f32 %v96_v38, %v83_v37 }
  0x92   :  { %v85_v42 = vpop.f32.mrf.mxu0  ;;  %v98_v43 = vpop.f32.mrf.mxu1 }
  0x93   :  { %v109_v39 = vpop.f32.mrf.mxu2  ;;  %v122_v40 = vpop.f32.mrf.mxu3 }
  0x94   :  { %v110_v44 = vadd.f32 %v109_v39, %v97_v41 }
  0x96   :  { %v123_v47 = vadd.f32 %v122_v40, %v110_v44 }
  0x9a   :  { %v135_v48 = vpop.f32.mrf.mxu0  ;;  %v148_v49 = vpop.f32.mrf.mxu1 }
  0x9b   :  { %v111_v45 = vpop.f32.mrf.mxu2  ;;  %v124_v46 = vpop.f32.mrf.mxu3  ;;  %v136_v50 = vadd.f32 %v135_v48, %v123_v47 }
  0x9d   :  { %v149_v51 = vadd.f32 %v148_v49, %v136_v50 }
  0xa2   :  { %v137_v55 = vpop.f32.mrf.mxu0  ;;  %v150_v56 = vpop.f32.mrf.mxu1 }
  0xa3   :  { %v161_v52 = vpop.f32.mrf.mxu2  ;;  %v174_v53 = vpop.f32.mrf.mxu3 }
  0xa4   :  { %v162_v54 = vadd.f32 %v161_v52, %v149_v51 }
  0xa6   :  { %v175_v58 = vadd.f32 %v174_v53, %v162_v54 }
  0xa8   :  { %v178_v59 = vadd.f32 %v175_v58, %v25_v57 }
  0xaa   :  { %180 = vst.msk [vmem:[%s259_s3] sm:$0xff] %vm23_vm0, %v178_v59 }
  0xab   :  { %v163_v60 = vpop.f32.mrf.mxu2  ;;  %v176_v61 = vpop.f32.mrf.mxu3 }

</bundles_post_ra>
